<compile_context>
chip_gen: v5e
topology: v5e:2x2
jax: 0.10.0
libtpu: 0.0.40
codegen_flags: <defaults>
</compile_context>

<pallas_src>
import jax
import jax.numpy as jnp
from jax.experimental import pallas as pl
from jax.experimental.pallas import tpu as pltpu


def disc_head_kernel(x_ref, p_ref, out_ref):
    # x_ref: (N, C*L)   flattened NCL input (no transpose needed)
    # p_ref: (C*L + 2*D + 8, D) packed parameter slab, D = 2*ndf.  Rows:
    #   [0:CL]            conv weight^T with each row repeated L times
    #   [CL:CL+D]         lin1 weight^T
    #   [CL+D:CL+2D]      lin2 weight^T
    #   [CL+2D:CL+2D+8]   L*conv_b, gamma, beta, b1, b2, w3_row, b3_bcast, pad
    CL = x_ref.shape[1]
    D = p_ref.shape[1]

    x = x_ref[...]                                                    # (N, CL)

    wpre = p_ref[0:CL, :]                                             # (CL, D)
    w1 = p_ref[CL:CL + D, :]                                          # (D, D)
    w2 = p_ref[CL + D:CL + 2 * D, :]                                  # (D, D)
    v = p_ref[CL + 2 * D:CL + 2 * D + 8, :]                           # (8, D)

    bpre_L = v[0:1, :]
    gamma = v[1:2, :]
    beta = v[2:3, :]
    b1 = v[3:4, :]
    b2 = v[4:5, :]
    w3row = v[5:6, :]
    b3 = v[6:7, 0:1]                                                  # (1, 1)

    # Conv1d(k=1) + sum over L folded into one lane-dense matmul:
    #   sum_l (W @ x[:, :, l] + b) = x_flat @ repeat(W^T, L) + L*b
    y = jnp.dot(x, wpre, preferred_element_type=jnp.float32) + bpre_L  # (N, D)

    # BatchNorm1d over the batch axis (training-mode stats, biased var, eps=1e-5,
    # fresh PyTorch module => gamma=1, beta=0 by default but kept general).
    n_inv = jnp.float32(1.0 / y.shape[0])
    mean = jnp.sum(y, axis=0, keepdims=True) * n_inv                   # (1, D)
    mean_sq = jnp.sum(y * y, axis=0, keepdims=True) * n_inv
    var = mean_sq - mean * mean
    yn = (y - mean) * jax.lax.rsqrt(var + jnp.float32(1e-5)) * gamma + beta

    # MLP head: Linear -> LeakyReLU(0.2) -> Linear -> LeakyReLU(0.2)
    h = jnp.dot(yn, w1, preferred_element_type=jnp.float32) + b1
    h = jnp.where(h > 0, h, 0.2 * h)
    h = jnp.dot(h, w2, preferred_element_type=jnp.float32) + b2
    h = jnp.where(h > 0, h, 0.2 * h)

    # Final Linear(D -> 1) on VPU/XLU: multiply + lane reduce (no width-1 MXU pass).
    out_ref[...] = jnp.sum(h * w3row, axis=-1, keepdims=True) + b3     # (N, 1)


def disc_head_forward(tup, params):
    """tup = (x0, x1, nn_vec); nn_vec is (N, ndf, L) NCL like PyTorch."""
    _x0, _x1, nn_vec = tup                 # x0, x1 are unused (as in PyTorch forward)
    N, C, L = nn_vec.shape
    D = 2 * C
    assert D % 8 == 0, "packed slab slicing assumes 2*ndf is a multiple of 8"

    # Free contiguous reshape NCL -> (N, C*L); no HBM transpose pass.
    x_flat = nn_vec.reshape(N, C * L).astype(jnp.float32)

    # Conv weight (2C, C, 1) -> (C, 2C), then repeat each row L times so that
    # row index c*L + l maps to W^T[c, :], matching x_flat[n, c*L + l] = x[n, c, l].
    wpre_rep = jnp.repeat(params["conv_w"][:, :, 0].T, L, axis=0)      # (C*L, D)

    # All small per-channel vectors packed into 8 rows.
    b3 = params["lin3_b"][0]
    vec_pack = jnp.stack(
        [
            jnp.float32(L) * params["conv_b"],   # folded length-sum bias
            params["bn_gamma"],
            params["bn_beta"],
            params["lin1_b"],
            params["lin2_b"],
            params["lin3_w"][0],                 # w3 row (D,)
            jnp.full((D,), b3, jnp.float32),     # b3 broadcast
            jnp.zeros((D,), jnp.float32),        # pad to 8 sublanes
        ],
        axis=0,
    )                                                                  # (8, D)

    # Single parameter slab => 2 kernel inputs total (x_flat, p_slab).
    p_slab = jnp.concatenate(
        [wpre_rep, params["lin1_w"].T, params["lin2_w"].T, vec_pack], axis=0
    ).astype(jnp.float32)                                              # (C*L+2D+8, D)

    vmem = pl.BlockSpec(memory_space=pltpu.MemorySpace.VMEM)
    out = pl.pallas_call(
        disc_head_kernel,
        out_shape=jax.ShapeDtypeStruct((N, 1), jnp.float32),
        in_specs=[vmem, vmem],
        out_specs=vmem,
    )(x_flat, p_slab)
    return out


def init_params(key, ndf):
    """Deterministic synthetic parameters with the same shapes as the PyTorch module."""
    d = 2 * ndf
    ks = jax.random.split(key, 8)
    s = 0.1
    return {
        "conv_w": s * jax.random.normal(ks[0], (d, ndf, 1), jnp.float32),  # Conv1d weight
        "conv_b": s * jax.random.normal(ks[1], (d,), jnp.float32),
        "bn_gamma": jnp.ones((d,), jnp.float32),
        "bn_beta": jnp.zeros((d,), jnp.float32),
        "lin1_w": s * jax.random.normal(ks[2], (d, d), jnp.float32),       # Linear(out,in)
        "lin1_b": s * jax.random.normal(ks[3], (d,), jnp.float32),
        "lin2_w": s * jax.random.normal(ks[4], (d, d), jnp.float32),
        "lin2_b": s * jax.random.normal(ks[5], (d,), jnp.float32),
        "lin3_w": s * jax.random.normal(ks[6], (1, d), jnp.float32),
        "lin3_b": s * jax.random.normal(ks[7], (1,), jnp.float32),
    }


def disc_head_reference(tup, params):
    """Pure-JAX reference mirroring the PyTorch forward (sanity check)."""
    _x0, _x1, nn_vec = tup
    w = params["conv_w"][:, :, 0]                          # (2ndf, ndf)
    y = jnp.einsum("oc,ncl->nol", w, nn_vec) + params["conv_b"][None, :, None]
    y = y.sum(axis=2)                                      # (N, 2ndf)
    mean = jnp.mean(y, axis=0, keepdims=True)
    var = jnp.mean((y - mean) ** 2, axis=0, keepdims=True)
    y = (y - mean) / jnp.sqrt(var + 1e-5) * params["bn_gamma"] + params["bn_beta"]

    def lrelu(v):
        return jnp.where(v > 0, v, 0.2 * v)

    y = lrelu(y @ params["lin1_w"].T + params["lin1_b"])
    y = lrelu(y @ params["lin2_w"].T + params["lin2_b"])
    return y @ params["lin3_w"].T + params["lin3_b"]


if __name__ == "__main__":
    N, ndf, L = 4, 8, 16
    key = jax.random.PRNGKey(0)
    k_x0, k_x1, k_nn, k_p = jax.random.split(key, 4)

    # x0, x1 are part of the tuple interface but unused by forward (as in PyTorch).
    x0 = jax.random.normal(k_x0, (N, ndf), jnp.float32)
    x1 = jax.random.normal(k_x1, (N, ndf), jnp.float32)
    nn_vec = jax.random.normal(k_nn, (N, ndf, L), jnp.float32)   # PyTorch NCL layout

    params = init_params(k_p, ndf)

    out = disc_head_forward((x0, x1, nn_vec), params)
    out = jax.block_until_ready(out)

    ref = disc_head_reference((x0, x1, nn_vec), params)
    assert out.shape == (N, 1)
    assert jnp.allclose(out, ref, atol=1e-4, rtol=1e-4), (out, ref)

    print("KERNEL_OK")
</pallas_src>

<mosaic_0001>
module attributes {stable_mosaic.version = 11 : i64} {
  func.func @disc_head_kernel(%arg0: memref<4x128xf32, #tpu.memory_space<vmem>>, %arg1: memref<168x16xf32, #tpu.memory_space<vmem>>, %arg2: memref<4x1xf32, #tpu.memory_space<vmem>>) attributes {dimension_semantics = [], scalar_prefetch = 0 : i64, scratch_operands = 0 : i64, tpu.core_type = #tpu.core_type<tc>} {
    %c0 = arith.constant 0 : index
    %c0_0 = arith.constant 0 : index
    %0 = vector.load %arg0[%c0, %c0_0] : memref<4x128xf32, #tpu.memory_space<vmem>>, vector<4x128xf32>
    %c0_1 = arith.constant 0 : index
    %c0_2 = arith.constant 0 : index
    %1 = vector.load %arg1[%c0_1, %c0_2] : memref<168x16xf32, #tpu.memory_space<vmem>>, vector<128x16xf32>
    %c128 = arith.constant 128 : index
    %c0_3 = arith.constant 0 : index
    %2 = vector.load %arg1[%c128, %c0_3] : memref<168x16xf32, #tpu.memory_space<vmem>>, vector<16x16xf32>
    %c144 = arith.constant 144 : index
    %c0_4 = arith.constant 0 : index
    %3 = vector.load %arg1[%c144, %c0_4] : memref<168x16xf32, #tpu.memory_space<vmem>>, vector<16x16xf32>
    %c160 = arith.constant 160 : index
    %c0_5 = arith.constant 0 : index
    %4 = vector.load %arg1[%c160, %c0_5] : memref<168x16xf32, #tpu.memory_space<vmem>>, vector<8x16xf32>
    %5 = vector.extract_strided_slice %4 {offsets = [0, 0], sizes = [1, 16], strides = [1, 1]} : vector<8x16xf32> to vector<1x16xf32>
    %6 = vector.extract_strided_slice %4 {offsets = [1, 0], sizes = [1, 16], strides = [1, 1]} : vector<8x16xf32> to vector<1x16xf32>
    %7 = vector.extract_strided_slice %4 {offsets = [2, 0], sizes = [1, 16], strides = [1, 1]} : vector<8x16xf32> to vector<1x16xf32>
    %8 = vector.extract_strided_slice %4 {offsets = [3, 0], sizes = [1, 16], strides = [1, 1]} : vector<8x16xf32> to vector<1x16xf32>
    %9 = vector.extract_strided_slice %4 {offsets = [4, 0], sizes = [1, 16], strides = [1, 1]} : vector<8x16xf32> to vector<1x16xf32>
    %10 = vector.extract_strided_slice %4 {offsets = [5, 0], sizes = [1, 16], strides = [1, 1]} : vector<8x16xf32> to vector<1x16xf32>
    %11 = vector.extract_strided_slice %4 {offsets = [6, 0], sizes = [1, 1], strides = [1, 1]} : vector<8x16xf32> to vector<1x1xf32>
    %cst = arith.constant dense<0.000000e+00> : vector<4x16xf32>
    %12 = tpu.matmul %0, %1, %cst {dimension_numbers = #tpu.dot_dimension_numbers<[1], [0], [0], [1], [0, 0, 1, 1], [], []>} : vector<4x128xf32>, vector<128x16xf32>, vector<4x16xf32> -> vector<4x16xf32>
    %13 = vector.broadcast %5 : vector<1x16xf32> to vector<4x16xf32>
    %14 = arith.addf %12, %13 : vector<4x16xf32>
    %cst_6 = arith.constant dense<0.000000e+00> : vector<16xf32>
    %15 = vector.multi_reduction <add>, %14, %cst_6 [0] : vector<4x16xf32> to vector<16xf32>
    %16 = vector.shape_cast %15 : vector<16xf32> to vector<1x16xf32>
    %cst_7 = arith.constant 2.500000e-01 : f32
    %17 = vector.broadcast %cst_7 : f32 to vector<1x16xf32>
    %18 = arith.mulf %16, %17 : vector<1x16xf32>
    %19 = arith.mulf %14, %14 : vector<4x16xf32>
    %cst_8 = arith.constant dense<0.000000e+00> : vector<16xf32>
    %20 = vector.multi_reduction <add>, %19, %cst_8 [0] : vector<4x16xf32> to vector<16xf32>
    %21 = vector.shape_cast %20 : vector<16xf32> to vector<1x16xf32>
    %cst_9 = arith.constant 2.500000e-01 : f32
    %22 = vector.broadcast %cst_9 : f32 to vector<1x16xf32>
    %23 = arith.mulf %21, %22 : vector<1x16xf32>
    %24 = arith.mulf %18, %18 : vector<1x16xf32>
    %25 = arith.subf %23, %24 : vector<1x16xf32>
    %26 = vector.broadcast %18 : vector<1x16xf32> to vector<4x16xf32>
    %27 = arith.subf %14, %26 : vector<4x16xf32>
    %cst_10 = arith.constant 9.99999974E-6 : f32
    %28 = vector.broadcast %cst_10 : f32 to vector<1x16xf32>
    %29 = arith.addf %25, %28 : vector<1x16xf32>
    %30 = math.rsqrt %29 : vector<1x16xf32>
    %31 = vector.broadcast %30 : vector<1x16xf32> to vector<4x16xf32>
    %32 = arith.mulf %27, %31 : vector<4x16xf32>
    %33 = vector.broadcast %6 : vector<1x16xf32> to vector<4x16xf32>
    %34 = arith.mulf %32, %33 : vector<4x16xf32>
    %35 = vector.broadcast %7 : vector<1x16xf32> to vector<4x16xf32>
    %36 = arith.addf %34, %35 : vector<4x16xf32>
    %cst_11 = arith.constant dense<0.000000e+00> : vector<4x16xf32>
    %37 = tpu.matmul %36, %2, %cst_11 {dimension_numbers = #tpu.dot_dimension_numbers<[1], [0], [0], [1], [0, 0, 1, 1], [], []>} : vector<4x16xf32>, vector<16x16xf32>, vector<4x16xf32> -> vector<4x16xf32>
    %38 = vector.broadcast %8 : vector<1x16xf32> to vector<4x16xf32>
    %39 = arith.addf %37, %38 : vector<4x16xf32>
    %cst_12 = arith.constant 0.000000e+00 : f32
    %40 = vector.broadcast %cst_12 : f32 to vector<4x16xf32>
    %41 = arith.cmpf ogt, %39, %40 : vector<4x16xf32>
    %cst_13 = arith.constant 2.000000e-01 : f32
    %42 = vector.broadcast %cst_13 : f32 to vector<4x16xf32>
    %43 = arith.mulf %42, %39 : vector<4x16xf32>
    %44 = arith.select %41, %39, %43 : vector<4x16xi1>, vector<4x16xf32>
    %cst_14 = arith.constant dense<0.000000e+00> : vector<4x16xf32>
    %45 = tpu.matmul %44, %3, %cst_14 {dimension_numbers = #tpu.dot_dimension_numbers<[1], [0], [0], [1], [0, 0, 1, 1], [], []>} : vector<4x16xf32>, vector<16x16xf32>, vector<4x16xf32> -> vector<4x16xf32>
    %46 = vector.broadcast %9 : vector<1x16xf32> to vector<4x16xf32>
    %47 = arith.addf %45, %46 : vector<4x16xf32>
    %cst_15 = arith.constant 0.000000e+00 : f32
    %48 = vector.broadcast %cst_15 : f32 to vector<4x16xf32>
    %49 = arith.cmpf ogt, %47, %48 : vector<4x16xf32>
    %cst_16 = arith.constant 2.000000e-01 : f32
    %50 = vector.broadcast %cst_16 : f32 to vector<4x16xf32>
    %51 = arith.mulf %50, %47 : vector<4x16xf32>
    %52 = arith.select %49, %47, %51 : vector<4x16xi1>, vector<4x16xf32>
    %53 = vector.broadcast %10 : vector<1x16xf32> to vector<4x16xf32>
    %54 = arith.mulf %52, %53 : vector<4x16xf32>
    %cst_17 = arith.constant dense<0.000000e+00> : vector<4xf32>
    %55 = vector.multi_reduction <add>, %54, %cst_17 [1] : vector<4x16xf32> to vector<4xf32>
    %56 = vector.shape_cast %55 : vector<4xf32> to vector<4x1xf32>
    %57 = vector.broadcast %11 : vector<1x1xf32> to vector<4x1xf32>
    %58 = arith.addf %56, %57 : vector<4x1xf32>
    %c0_18 = arith.constant 0 : index
    %c0_19 = arith.constant 0 : index
    %59 = vector.load %arg2[%c0_18, %c0_19] : memref<4x1xf32, #tpu.memory_space<vmem>>, vector<4x1xf32>
    tpu.vector_store %arg2[%c0_18, %c0_19], %58 {strides = array<i32>} : memref<4x1xf32, #tpu.memory_space<vmem>>, vector<4x1xf32>,
    return
  }
}

</mosaic_0001>

<bundles_post_ra>
// kernel: tpu_custom_call.1
= control target key start
LH: loop header
LB: loop body
LE: loop exit
PB: predicated region body
PF: predicated region fallthrough
CT: control target
= control target key end

     0   :  { %vm54_vm0 = vcmask 125952   ;;  %vm92_vm4 = vcmask 130048   ;;  %vm153_vm7 = vcmask 3072   ;;  %s259_s1 = inlined_call_operand.vmem [shape: f32[168,16], index: 1, kind: input, shape index: {}]   ;;  %s260_s0 = inlined_call_operand.vmem [shape: f32[4,128], index: 0, kind: input, shape index: {}]   ;;  %s261_s2 = inlined_call_operand.vmem [shape: f32[4,1], index: 2, kind: output, shape index: {}]  }
   0x1   :  { %v27_v0 = vld [vmem:[%s259_s1 + $0x78] sm:$0xff]  ;;  %v26_v1 = vld [vmem:[%s259_s1 + $0x70] sm:$0xff]  ;;  %v25_v2 = vld [vmem:[%s259_s1 + $0x68] sm:$0xff] }
   0x2   :  { %34 = vmatpush.msra.mxu0 %v27_v0  ;;  %v24_v3 = vld [vmem:[%s259_s1 + $0x60] sm:$0xff]  ;;  %v23_v4 = vld [vmem:[%s259_s1 + $0x58] sm:$0xff]  ;;  %v22_v5 = vld [vmem:[%s259_s1 + $0x50] sm:$0xff] }
   0x3   :  { %v21_v6 = vld [vmem:[%s259_s1 + $0x48] sm:$0xff]  ;;  %v20_v7 = vld [vmem:[%s259_s1 + $0x40] sm:$0xff]  ;;  %v19_v8 = vld [vmem:[%s259_s1 + $0x38] sm:$0xff] }
   0x4   :  { %35 = vmatpush.msra.mxu0 %v26_v1  ;;  %v18_v9 = vld [vmem:[%s259_s1 + $0x30] sm:$0xff]  ;;  %v17_v10 = vld [vmem:[%s259_s1 + $0x28] sm:$0xff]  ;;  %v16_v11 = vld [vmem:[%s259_s1 + $0x20] sm:$0xff] }
   0x5   :  { %v15_v12 = vld [vmem:[%s259_s1 + $0x18] sm:$0xff]  ;;  %v14_v13 = vld [vmem:[%s259_s1 + $0x10] sm:$0xff]  ;;  %v13_v14 = vld [vmem:[%s259_s1 + $0x8] sm:$0xff] }
   0x6   :  { %36 = vmatpush.msra.mxu0 %v25_v2  ;;  %v12_v15 = vld [vmem:[%s259_s1] sm:$0xff]  ;;  %v29_v31 = vld [vmem:[%s259_s1 + $0x88] sm:$0xff]  ;;  %v31_v56 = vld [vmem:[%s259_s1 + $0x98] sm:$0xff] }
   0x7   :  { %v11_v16 = vld [vmem:[%s260_s0] sm:$0xf]  ;;  %110 = vmatpush.msra.mxu1 %v29_v31  ;;  %137 = vmatpush.msra.mxu2 %v31_v56  ;;  %v30_v57 = vld [vmem:[%s259_s1 + $0x90] sm:$0xff] }
   0x8   :  { %37 = vmatpush.msra.mxu0 %v24_v3  ;;  %v232_v17 = vld [vmem:[%s259_s1 + $0xa0] sm:$0xff] }
   0x9   :  { %v33_v18 = vperm.slane %v232_v17, 0  ;;  %v28_v32 = vld [vmem:[%s259_s1 + $0x80] sm:$0xff]  ;;  %v87_v50 = vperm.slane %v232_v17, 1  ;;  %v89_v53 = vperm.slane %v232_v17, 2  ;;  %138 = vmatpush.msra.mxu2 %v30_v57  ;;  %v91_v58 = vperm.slane %v232_v17, 3 }
   0xa   :  { %38 = vmatpush.msra.mxu0 %v23_v4  ;;  %111 = vmatpush.msra.mxu1 %v28_v32  ;;  %v119_v63 = vperm.slane %v232_v17, 4  ;;  %v146_v2 = vperm.slane %v232_v17, 5 }
   0xc   :  { %39 = vmatpush.msra.mxu0 %v22_v5 }
   0xe   :  { %40 = vmatpush.msra.mxu0 %v21_v6 }
  0x10   :  { %41 = vmatpush.msra.mxu0 %v20_v7  ;;  %v151_v7 = vperm.slane %v232_v17, 6 }
  0x12   :  { %42 = vmatpush.msra.mxu0 %v19_v8 }
  0x14   :  { %43 = vmatpush.msra.mxu0 %v18_v9 }
  0x16   :  { %44 = vmatpush.msra.mxu0 %v17_v10 }
  0x18   :  { %45 = vmatpush.msra.mxu0 %v16_v11 }
  0x1a   :  { %46 = vmatpush.msra.mxu0 %v15_v12 }
  0x1c   :  { %47 = vmatpush.msra.mxu0 %v14_v13 }
  0x1e   :  { %48 = vmatpush.msra.mxu0 %v13_v14 }
  0x20   :  { %49 = vmatpush.msra.mxu0 %v12_v15 }
  0x21   :  { %50 = vmatmul.f32.vlgmr.msra.gmra.mxu0 %v11_v16 }
  0x9e   :  { %v51_v19 = vpop.f32.mrf.mxu0 }
  0x9f   :  { %v52_v20 = vadd.f32 %v51_v19, %v33_v18 }
  0xa1   :  { %v55_v21 = vsel %vm54_vm0, %v52_v20, 0.0  ;;  %v63_v22 = vmul.f32 %v52_v20, %v52_v20 }
  0xa2   :  { %v56_v23 = vrot.slane %v55_v21, 4 }
  0xa3   :  { %v64_v24 = vsel %vm54_vm0, %v63_v22, 0.0 }
  0xa4   :  { %v57_v25 = vadd.f32 %v56_v23, %v55_v21  ;;  %v65_v26 = vrot.slane %v64_v24, 4 }
  0xa6   :  { %v58_v27 = vrot.slane %v57_v25, 2  ;;  %v66_v28 = vadd.f32 %v65_v26, %v64_v24 }
  0xa8   :  { %v59_v29 = vadd.f32 %v58_v27, %v57_v25  ;;  %v67_v30 = vrot.slane %v66_v28, 2 }
  0xaa   :  { %v60_v33 = vrot.slane %v59_v29, 1  ;;  %v68_v34 = vadd.f32 %v67_v30, %v66_v28 }
  0xac   :  { %v61_v35 = vadd.f32 %v60_v33, %v59_v29  ;;  %v69_v36 = vrot.slane %v68_v34, 1 }
  0xae   :  { %v62_v37 = vmul.f32 0.25, %v61_v35  ;;  %v70_v38 = vadd.f32 %v69_v36, %v68_v34 }
  0xb0   :  { %v71_v39 = vmul.f32 0.25, %v70_v38  ;;  %v72_v40 = vmul.f32 %v62_v37, %v62_v37  ;;  %v74_v49 = vsub.f32 %v52_v20, %v62_v37 }
  0xb2   :  { %v73_v41 = vsub.f32 %v71_v39, %v72_v40 }
  0xb4   :  { %v75_v42 = vadd.f32 1e-05, %v73_v41 }
  0xb6   :  { %161 = vrsqrt.f32 %v75_v42  ;;  %vm82_vm2 = vweird.f32 %v75_v42 }
  0xbc   :  { %v162_v43 = vpop.eup %161 }
  0xbd   :  { %v77_v44 = vmul.f32 %v162_v43, %v75_v42  ;;  %vm83_vm1 = vweird.f32 %v162_v43 }
  0xbe   :  { %vm84_vm3 = vmor %vm82_vm2, %vm83_vm1 }
  0xbf   :  { %v78_v45 = vmul.f32 %v162_v43, %v77_v44 }
  0xc1   :  { %v79_v46 = vmul.f32 0.5, %v78_v45 }
  0xc3   :  { %v80_v47 = vsub.f32 1.5, %v79_v46 }
  0xc5   :  { %v81_v48 = vmul.f32 %v162_v43, %v80_v47 }
  0xc7   :  { %v85_v51 = vsel %vm84_vm3, %v162_v43, %v81_v48 }
  0xc8   :  { %v86_v52 = vmul.f32 %v85_v51, %v74_v49 }
  0xca   :  { %v88_v54 = vmul.f32 %v87_v50, %v86_v52 }
  0xcc   :  { %v90_v55 = vadd.f32 %v89_v53, %v88_v54 }
  0xce   :  { %159 = vmatmul.msk.f32.vlgmr.msra.gmra.mxu1 %vm92_vm4, %v90_v55 }
 0x14b   :  { %v113_v59 = vpop.f32.mrf.mxu1 }
 0x14c   :  { %v114_v60 = vadd.f32 %v113_v59, %v91_v58 }
 0x14e   :  { %v117_v61 = vmul.f32 0.2, %v114_v60  ;;  %vm116_vm5 = vcmp.gt.f32.partialorder %v114_v60, 0.0 }
 0x150   :  { %v118_v62 = vsel %vm116_vm5, %v114_v60, %v117_v61 }
 0x151   :  { %160 = vmatmul.msk.f32.vlgmr.msra.gmra.mxu2 %vm92_vm4, %v118_v62 }
 0x1d4   :  { %v140_v0 = vpop.f32.mrf.mxu2 }
 0x1d5   :  { %v141_v1 = vadd.f32 %v140_v0, %v119_v63 }
 0x1d7   :  { %v144_v3 = vmul.f32 0.2, %v141_v1  ;;  %vm143_vm6 = vcmp.gt.f32.partialorder %v141_v1, 0.0 }
 0x1d9   :  { %v145_v4 = vsel %vm143_vm6, %v141_v1, %v144_v3 }
 0x1da   :  { %v147_v5 = vmul.f32 %v146_v2, %v145_v4 }
 0x1dc   :  { %v148_v6 = vsel %vm54_vm0, %v147_v5, 0.0 }
 0x1dd   :  { %149 = vadd.xlane.f32.xlu0 %v148_v6 }
 0x250   :  { %v150_v8 = vpop.xlane.xlu0 %149 }
 0x251   :  { %v152_v9 = vadd.f32 %v151_v7, %v150_v8 }
 0x253   :  { %154 = vst.msk [vmem:[%s261_s2] sm:$0xf] %vm153_vm7, %v152_v9 }

</bundles_post_ra>
